<compile_context>
chip_gen: v5e
topology: v5e:2x2
jax: 0.10.0
libtpu: 0.0.40
codegen_flags: <defaults>
</compile_context>

<pallas_src>
import functools

import jax
import jax.numpy as jnp
import numpy as np
from jax.experimental import pallas as pl
from jax.experimental.pallas import tpu as pltpu


def _round_up(x, m):
    return -(-x // m) * m


def _bond_angle_kernel(angle_ref, lut_ref, o_ref, *, inv_angle_unit, clip_hi):
    """Fused: quantize angle -> one-hot -> single matmul against (E@W + b) LUT."""
    # Quantization stays in f32 regardless of LUT/output dtype (v5e-safe).
    a = angle_ref[...].astype(jnp.float32)                      # (tile_n, 1)
    dom = jnp.clip(a * inv_angle_unit, 1.0, clip_hi)
    idx = dom.astype(jnp.int32)                                 # trunc == floor (>= 1)

    tile_n = angle_ref.shape[0]
    n_rows = lut_ref.shape[0]
    row_ids = jax.lax.broadcasted_iota(jnp.int32, (tile_n, n_rows), 1)
    onehot = (row_ids == idx).astype(lut_ref.dtype)             # (tile_n, n_rows)

    # Exact row selection on the MXU: onehot @ (E@W + b) == E[idx]@W + b.
    y = jnp.dot(onehot, lut_ref[...], preferred_element_type=jnp.float32)
    # TODO(synk): training-mode dropout (pltpu.prng_seed + stateful_bernoulli);
    #             eval-mode nn.Dropout is the identity, which is what we match.
    o_ref[...] = y.astype(o_ref.dtype)


def bond_angle_embedding_pallas(angle_feat, emb_table, w, b, *, n_angle,
                                tile_n=1024, lut_dtype=None, out_dtype=None):
    """Fused BondAngleEmbedding forward.

    angle_feat: (N,) or (N, 1) float angles.
    emb_table : (n_angle + 1, embed_dim) embedding weights.
    w         : (embed_dim, d_hidden)  in_proj weight, pre-transposed (in, out).
    b         : (d_hidden,)            in_proj bias.
    lut_dtype : optional (e.g. jnp.bfloat16) dtype for the fused LUT / matmul.
    out_dtype : optional output dtype (defaults to angle_feat.dtype).
    """
    # torch: angle_unit = float32(pi) / n_angle; we multiply by its reciprocal.
    angle_unit = float(np.float32(np.pi) / np.float32(n_angle))
    inv_angle_unit = 1.0 / angle_unit
    clip_hi = float(n_angle) - 1e-6

    af = angle_feat.reshape(-1)            # torch .squeeze()
    n = af.shape[0]
    d_hidden = w.shape[1]
    out_dtype = out_dtype or angle_feat.dtype
    lut_dtype = lut_dtype or jnp.float32

    # Fuse embedding table + in_proj into one tiny LUT (computed once in f32).
    lut = (emb_table.astype(jnp.float32) @ w.astype(jnp.float32)
           + b.astype(jnp.float32).reshape(1, d_hidden)).astype(lut_dtype)

    # Pad LUT rows to a sublane multiple and columns to a lane multiple so the
    # output store stays lane-dense (unmasked vst).  Indices never reach the
    # zero pad rows; padded columns are sliced off below.
    n_rows = lut.shape[0]
    n_rows_pad = _round_up(n_rows, 8)
    d_hidden_pad = _round_up(d_hidden, 128)
    if (n_rows_pad, d_hidden_pad) != lut.shape:
        lut = jnp.pad(lut, ((0, n_rows_pad - n_rows),
                            (0, d_hidden_pad - d_hidden)))

    # Tile N: one grid step for small N; otherwise ~tile_n rows per step with an
    # even step count so v7x's two TensorCores split the parallel axis evenly.
    n_pad8 = _round_up(max(n, 1), 8)
    if n_pad8 <= tile_n:
        tile = n_pad8
        n_tiles = 1
    else:
        n_tiles = -(-n_pad8 // tile_n)
        if n_tiles % 2 == 1:
            n_tiles += 1
        tile = _round_up(-(-n_pad8 // n_tiles), 8)
        n_tiles = -(-n_pad8 // tile)
    n_pad = n_tiles * tile

    af2 = af.reshape(n, 1).astype(jnp.float32)
    if n_pad != n:
        af2 = jnp.pad(af2, ((0, n_pad - n), (0, 0)))   # pad rows hit bin 1; sliced off

    kernel = functools.partial(_bond_angle_kernel,
                               inv_angle_unit=inv_angle_unit, clip_hi=clip_hi)

    flops = 2 * n_pad * n_rows_pad * d_hidden_pad
    bytes_accessed = (af2.size * af2.dtype.itemsize
                      + lut.size * lut.dtype.itemsize
                      + n_pad * d_hidden_pad * jnp.dtype(out_dtype).itemsize)

    out = pl.pallas_call(
        kernel,
        out_shape=jax.ShapeDtypeStruct((n_pad, d_hidden_pad), out_dtype),
        grid_spec=pltpu.PrefetchScalarGridSpec(
            num_scalar_prefetch=0,
            grid=(n_tiles,),
            in_specs=[
                pl.BlockSpec((tile, 1), lambda i: (i, 0)),                  # angles
                pl.BlockSpec((n_rows_pad, d_hidden_pad), lambda i: (0, 0)),  # fused LUT (VMEM-resident)
            ],
            out_specs=pl.BlockSpec((tile, d_hidden_pad), lambda i: (i, 0)),
        ),
        compiler_params=pltpu.CompilerParams(
            dimension_semantics=("parallel",)),
        cost_estimate=pl.CostEstimate(
            flops=flops, transcendentals=0, bytes_accessed=bytes_accessed),
    )(af2, lut)

    return out[:n, :d_hidden]


class BondAngleEmbeddingPallas:
    """Mirror of the PyTorch BondAngleEmbedding (inference mode)."""

    def __init__(self, n_angle, embed_dim, d_hidden, input_drop, key,
                 dtype=jnp.float32):
        self.n_angle = n_angle
        self.input_drop = input_drop   # eval-mode dropout == identity
        k_e, k_w, k_b = jax.random.split(key, 3)
        # nn.Embedding default init ~ N(0, 1)
        self.emb = jax.random.normal(k_e, (n_angle + 1, embed_dim), dtype)
        # nn.Linear-style init, weight stored pre-transposed as (in, out)
        bound = 1.0 / float(np.sqrt(embed_dim))
        self.w = jax.random.uniform(k_w, (embed_dim, d_hidden), dtype,
                                    -bound, bound)
        self.b = jax.random.uniform(k_b, (d_hidden,), dtype, -bound, bound)

    def __call__(self, angle_feat):
        return bond_angle_embedding_pallas(angle_feat, self.emb, self.w,
                                           self.b, n_angle=self.n_angle)


def bond_angle_embedding_reference(angle_feat, emb_table, w, b, n_angle):
    """Pure-JAX reference for correctness checking.

    Uses the same multiply-by-1/angle_unit constant as the kernel (identical
    to torch's divide except within ~2 ulp of an exact f32 bin boundary).
    """
    angle_unit = float(np.float32(np.pi) / np.float32(n_angle))
    inv_angle_unit = 1.0 / angle_unit
    dom = angle_feat.reshape(-1).astype(jnp.float32) * inv_angle_unit
    idx = jnp.clip(dom, 1.0, float(n_angle) - 1e-6).astype(jnp.int32)
    h = jnp.take(emb_table, idx, axis=0)
    return h @ w + b


if __name__ == "__main__":
    key = jax.random.PRNGKey(0)
    k_param, k_x = jax.random.split(key)

    # Small shapes consistent with the module: n_angle=8 bins, embed_dim=32,
    # d_hidden=128 (lane-dense output), N=300 bond angles (non-tile-multiple,
    # exercises the padded single-step path).
    n_angle, embed_dim, d_hidden = 8, 32, 128
    n = 300
    input_drop = 0.1   # inference -> identity

    module = BondAngleEmbeddingPallas(n_angle, embed_dim, d_hidden,
                                      input_drop, k_param)
    # bond angles in [0, pi), shaped (N, 1) like the torch input pre-squeeze
    angle_feat = jax.random.uniform(k_x, (n, 1), jnp.float32,
                                    minval=0.0, maxval=float(np.pi))

    out = module(angle_feat)
    out = jax.block_until_ready(out)

    ref = bond_angle_embedding_reference(angle_feat, module.emb, module.w,
                                         module.b, n_angle)
    assert out.shape == (n, d_hidden), out.shape
    assert jnp.allclose(out, ref, atol=1e-5, rtol=1e-5), (
        "mismatch vs reference, max abs err = "
        + str(float(jnp.max(jnp.abs(out - ref)))))

    print("KERNEL_OK")
</pallas_src>

<mosaic_0001>
module attributes {stable_mosaic.version = 11 : i64} {
  func.func @_bond_angle_kernel(%arg0: i32, %arg1: memref<304x1xf32, #tpu.memory_space<vmem>>, %arg2: memref<16x128xf32, #tpu.memory_space<vmem>>, %arg3: memref<304x128xf32, #tpu.memory_space<vmem>>) attributes {dimension_semantics = [#tpu.dimension_semantics<parallel>], iteration_bounds = array<i64: 1>, scalar_prefetch = 0 : i64, scratch_operands = 0 : i64, tpu.core_type = #tpu.core_type<tc>, window_params = [{transform_indices = @transform_0, window_bounds = array<i64: 304, 1>}, {pipeline_mode = #tpu.pipeline_mode<synchronous>, transform_indices = @transform_1, window_bounds = array<i64: 16, 128>}, {transform_indices = @transform_2, window_bounds = array<i64: 304, 128>}]} {
    %c0 = arith.constant 0 : index
    %c0_0 = arith.constant 0 : index
    %0 = vector.load %arg1[%c0, %c0_0] : memref<304x1xf32, #tpu.memory_space<vmem>>, vector<304x1xf32>
    %cst = arith.constant 2.54647899 : f32
    %1 = vector.broadcast %cst : f32 to vector<304x1xf32>
    %2 = arith.mulf %0, %1 : vector<304x1xf32>
    %cst_1 = arith.constant 1.000000e+00 : f32
    %cst_2 = arith.constant 7.99999904 : f32
    %3 = vector.broadcast %cst_1 : f32 to vector<304x1xf32>
    %4 = arith.maximumf %3, %2 : vector<304x1xf32>
    %5 = vector.broadcast %cst_2 : f32 to vector<304x1xf32>
    %6 = arith.minimumf %5, %4 : vector<304x1xf32>
    %7 = arith.fptosi %6 : vector<304x1xf32> to vector<304x1xi32>
    %8 = tpu.iota {dimensions = array<i32: 1>} : vector<304x16xi32>
    %9 = vector.broadcast %7 : vector<304x1xi32> to vector<304x16xi32>
    %10 = arith.cmpi eq, %8, %9 : vector<304x16xi32>
    %11 = arith.extui %10 : vector<304x16xi1> to vector<304x16xi32>
    %12 = arith.sitofp %11 : vector<304x16xi32> to vector<304x16xf32>
    %c0_3 = arith.constant 0 : index
    %c0_4 = arith.constant 0 : index
    %13 = vector.load %arg2[%c0_3, %c0_4] : memref<16x128xf32, #tpu.memory_space<vmem>>, vector<16x128xf32>
    %cst_5 = arith.constant dense<0.000000e+00> : vector<304x128xf32>
    %14 = tpu.matmul %12, %13, %cst_5 {dimension_numbers = #tpu.dot_dimension_numbers<[1], [0], [0], [1], [0, 0, 1, 1], [], []>} : vector<304x16xf32>, vector<16x128xf32>, vector<304x128xf32> -> vector<304x128xf32>
    %c0_6 = arith.constant 0 : index
    %c0_7 = arith.constant 0 : index
    %15 = vector.load %arg3[%c0_6, %c0_7] : memref<304x128xf32, #tpu.memory_space<vmem>>, vector<304x128xf32>
    tpu.vector_store %arg3[%c0_6, %c0_7], %14 {strides = array<i32>} : memref<304x128xf32, #tpu.memory_space<vmem>>, vector<304x128xf32>,
    return
  }
  func.func @transform_0(%arg0: i32) -> (i32, i32) {
    %c0_i32 = arith.constant 0 : i32
    %c0_i32_0 = arith.constant 0 : i32
    return %arg0, %c0_i32 : i32, i32
  }
  func.func @transform_1(%arg0: i32) -> (i32, i32) {
    %c0_i32 = arith.constant 0 : i32
    %c0_i32_0 = arith.constant 0 : i32
    %c0_i32_1 = arith.constant 0 : i32
    return %c0_i32, %c0_i32_0 : i32, i32
  }
  func.func @transform_2(%arg0: i32) -> (i32, i32) {
    %c0_i32 = arith.constant 0 : i32
    %c0_i32_0 = arith.constant 0 : i32
    return %arg0, %c0_i32 : i32, i32
  }
}

</mosaic_0001>

<bundles_post_ra>
// kernel: tpu_custom_call.1
= control target key start
LH: loop header
LB: loop body
LE: loop exit
PB: predicated region body
PF: predicated region fallthrough
CT: control target
= control target key end

     0   :  { %v1042_v3 = vmov 0   ;;  %s1305_s0 = inlined_call_operand.vmem [shape: f32[304,1], index: 0, kind: input, shape index: {}]   ;;  %s1306_s1 = inlined_call_operand.vmem [shape: f32[16,128], index: 1, kind: input, shape index: {}]   ;;  %s1307_s2 = inlined_call_operand.hbm [shape: f32[304,128], index: 2, kind: output, shape index: {}]  }
   0x1   :  { %v32_v0 = vld [vmem:[%s1305_s0 + $0xa0] sm:$0xff]  ;;  %v22_v1 = vld [vmem:[%s1305_s0 + $0x50] sm:$0xff]  ;;  %v13_v2 = vld [vmem:[%s1305_s0 + $0x8] sm:$0xff]  ;;  %1015 = vset.pattern.permute.xlu2 %v1042_v3  ;;  %1014 = vset.pattern.permute.xlu1 %v1042_v3 }
   0x2   :  { %v70_v4 = vmul.f32 2.546479, %v32_v0  ;;  %v60_v5 = vmul.f32 2.546479, %v22_v1  ;;  %v51_v6 = vmul.f32 2.546479, %v13_v2  ;;  %1013 = vset.pattern.permute.xlu0 %v1042_v3 }
   0x3   :  { %v33_v7 = vld [vmem:[%s1305_s0 + $0xa8] sm:$0xff]  ;;  %v23_v8 = vld [vmem:[%s1305_s0 + $0x58] sm:$0xff]  ;;  %v12_v9 = vld [vmem:[%s1305_s0] sm:$0xff] }
   0x4   :  { %v108_v10 = vmax.f32 %v70_v4, 1.0  ;;  %v98_v11 = vmax.f32 %v60_v5, 1.0  ;;  %v89_v12 = vmax.f32 %v51_v6, 1.0  ;;  %v71_v13 = vmul.f32 2.546479, %v33_v7  ;;  %v42_v14 = vld [vmem:[%s1305_s0 + $0xf0] sm:$0xff] }
   0x5   :  { %v61_v15 = vmul.f32 2.546479, %v23_v8  ;;  %v50_v16 = vmul.f32 2.546479, %v12_v9  ;;  %v80_v17 = vmul.f32 2.546479, %v42_v14 }
   0x6   :  { %v146_v18 = vmin.f32 %v108_v10, 7.999999  ;;  %v136_v19 = vmin.f32 %v98_v11, 7.999999  ;;  %v127_v20 = vmin.f32 %v89_v12, 7.999999 }
   0x7   :  { %v109_v21 = vmax.f32 %v71_v13, 1.0  ;;  %v99_v22 = vmax.f32 %v61_v15, 1.0  ;;  %v88_v23 = vmax.f32 %v50_v16, 1.0  ;;  %v118_v24 = vmax.f32 %v80_v17, 1.0 }
   0x8   :  { %vm918_vm0 = vcmp.lt.s32.totalorder %v146_v18, 0  ;;  %v919_v25 = vceil.f32 %v146_v18  ;;  %v920_v26 = vfloor.f32 %v146_v18  ;;  %vm868_vm1 = vcmp.lt.s32.totalorder %v136_v19, 0 }
   0x9   :  { %v869_v27 = vceil.f32 %v136_v19  ;;  %v870_v28 = vfloor.f32 %v136_v19  ;;  %vm823_vm2 = vcmp.lt.s32.totalorder %v127_v20, 0  ;;  %v824_v29 = vceil.f32 %v127_v20 }
   0xa   :  { %v921_v30 = vsel %vm918_vm0, %v919_v25, %v920_v26  ;;  %v825_v31 = vfloor.f32 %v127_v20  ;;  %v147_v32 = vmin.f32 %v109_v21, 7.999999  ;;  %v137_v33 = vmin.f32 %v99_v22, 7.999999 }
   0xb   :  { %7 = vsyncpa [#allocation3], 0  ;;  %v922_v34 = vcvt.f32.s32 %v921_v30  ;;  %v871_v35 = vsel %vm868_vm1, %v869_v27, %v870_v28  ;;  %v126_v36 = vmin.f32 %v88_v23, 7.999999  ;;  %v156_v37 = vmin.f32 %v118_v24, 7.999999 }
   0xc   :  { %v872_v38 = vcvt.f32.s32 %v871_v35  ;;  %v826_v39 = vsel %vm823_vm2, %v824_v29, %v825_v31  ;;  %vm923_vm3 = vcmp.lt.s32.totalorder %v147_v32, 0  ;;  %v924_v40 = vceil.f32 %v147_v32  ;;  %v14_v44 = vld [vmem:[%s1305_s0 + $0x10] sm:$0xff]  ;;  %v35_v50 = vld [vmem:[%s1305_s0 + $0xb8] sm:$0xff]  ;;  %v24_v55 = vld [vmem:[%s1305_s0 + $0x60] sm:$0xff]  ;;  %s724_s7 = sshll.u32 %s1307_s2, 4  ;;  %s1045_s8 = smov 128   ;;  %s725_s7 = int_to_ptr.hbm [resolvable:$true] %s724_s7 }
   0xd   :  { %265 = vperm.xlu0 %1013, %v922_v34   ;;  %v827_v41 = vcvt.f32.s32 %v826_v39  ;;  %v925_v42 = vfloor.f32 %v147_v32  ;;  %vm873_vm4 = vcmp.lt.s32.totalorder %v137_v33, 0  ;;  %v874_v43 = vceil.f32 %v137_v33  ;;  %v34_v48 = vld [vmem:[%s1305_s0 + $0xb0] sm:$0xff]  ;;  %v43_v51 = vld [vmem:[%s1305_s0 + $0xf8] sm:$0xff]  ;;  %v25_v60 = vld [vmem:[%s1305_s0 + $0x68] sm:$0xff]  ;;  %s1046_s9 = smov 8  }
   0xe   :  { %235 = vperm.xlu1 %1014, %v872_v38   ;;  %v875_v45 = vfloor.f32 %v137_v33  ;;  %vm818_vm5 = vcmp.lt.s32.totalorder %v126_v36, 0  ;;  %v819_v46 = vceil.f32 %v126_v36  ;;  %v820_v47 = vfloor.f32 %v126_v36  ;;  %v15_v1 = vld [vmem:[%s1305_s0 + $0x18] sm:$0xff]  ;;  %v36_v12 = vld [vmem:[%s1305_s0 + $0xc0] sm:$0xff]  ;;  %v26_v38 = vld [vmem:[%s1305_s0 + $0x70] sm:$0xff] }
   0xf   :  { %208 = vperm.xlu2 %1015, %v827_v41   ;;  %v926_v49 = vsel %vm923_vm3, %v924_v40, %v925_v42  ;;  %vm968_vm6 = vcmp.lt.s32.totalorder %v156_v37, 0  ;;  %v52_v54 = vmul.f32 2.546479, %v14_v44  ;;  %v969_v57 = vceil.f32 %v156_v37  ;;  %v16_v33 = vld [vmem:[%s1305_s0 + $0x20] sm:$0xff] }
  0x10   :  { %v876_v52 = vsel %vm873_vm4, %v874_v43, %v875_v45  ;;  %v821_v53 = vsel %vm818_vm5, %v819_v46, %v820_v47  ;;  %v970_v58 = vfloor.f32 %v156_v37  ;;  %v72_v59 = vmul.f32 2.546479, %v34_v48  ;;  %v44_v37 = vld [vmem:[%s1305_s0 + $0x100] sm:$0xff] }
  0x11   :  { %v822_v56 = vcvt.f32.s32 %v821_v53  ;;  %v927_v61 = vcvt.f32.s32 %v926_v49  ;;  %v90_v62 = vmax.f32 %v52_v54, 1.0  ;;  %v73_v63 = vmul.f32 2.546479, %v35_v50  ;;  %v45_v54 = vld [vmem:[%s1305_s0 + $0x108] sm:$0xff] }
  0x12   :  { %v81_v0 = vmul.f32 2.546479, %v43_v51  ;;  %v877_v2 = vcvt.f32.s32 %v876_v52  ;;  %v110_v3 = vmax.f32 %v72_v59, 1.0  ;;  %v62_v4 = vmul.f32 2.546479, %v24_v55 }
  0x13   :  { %v128_v5 = vmin.f32 %v90_v62, 7.999999  ;;  %v111_v6 = vmax.f32 %v73_v63, 1.0  ;;  %v63_v8 = vmul.f32 2.546479, %v25_v60  ;;  %v971_v9 = vsel %vm968_vm6, %v969_v57, %v970_v58 }
  0x14   :  { %v119_v7 = vmax.f32 %v81_v0, 1.0  ;;  %v148_v10 = vmin.f32 %v110_v3, 7.999999  ;;  %v100_v11 = vmax.f32 %v62_v4, 1.0  ;;  %v53_v13 = vmul.f32 2.546479, %v15_v1 }
  0x15   :  { %205 = vperm.xlu0 %1013, %v822_v56   ;;  %vm828_vm7 = vcmp.lt.s32.totalorder %v128_v5, 0  ;;  %v829_v14 = vceil.f32 %v128_v5  ;;  %v830_v15 = vfloor.f32 %v128_v5  ;;  %v149_v16 = vmin.f32 %v111_v6, 7.999999  ;;  %v37_v0 = vld [vmem:[%s1305_s0 + $0xc8] sm:$0xff] }
  0x16   :  { %268 = vperm.xlu1 %1014, %v927_v61   ;;  %vm928_vm8 = vcmp.lt.s32.totalorder %v148_v10, 0  ;;  %v929_v17 = vceil.f32 %v148_v10  ;;  %v930_v18 = vfloor.f32 %v148_v10  ;;  %v157_v19 = vmin.f32 %v119_v7, 7.999999  ;;  %v17_v61 = vld [vmem:[%s1305_s0 + $0x28] sm:$0xff] }
  0x17   :  { %238 = vperm.xlu2 %1015, %v877_v2   ;;  %v831_v20 = vsel %vm828_vm7, %v829_v14, %v830_v15  ;;  %v74_v21 = vmul.f32 2.546479, %v36_v12  ;;  %v972_v22 = vcvt.f32.s32 %v971_v9  ;;  %vm933_vm9 = vcmp.lt.s32.totalorder %v149_v16, 0  ;;  %v38_v15 = vld [vmem:[%s1305_s0 + $0xd0] sm:$0xff] }
  0x18   :  { %v931_v23 = vsel %vm928_vm8, %v929_v17, %v930_v18  ;;  %v101_v24 = vmax.f32 %v63_v8, 1.0  ;;  %v934_v26 = vceil.f32 %v149_v16  ;;  %v935_v27 = vfloor.f32 %v149_v16  ;;  %v27_v18 = vld [vmem:[%s1305_s0 + $0x78] sm:$0xff] }
  0x19   :  { %v932_v25 = vcvt.f32.s32 %v931_v23  ;;  %v138_v28 = vmin.f32 %v100_v11, 7.999999  ;;  %v832_v29 = vcvt.f32.s32 %v831_v20  ;;  %v974_v30 = vceil.f32 %v157_v19 }
  0x1a   :  { %v975_v31 = vfloor.f32 %v157_v19  ;;  %v91_v32 = vmax.f32 %v53_v13, 1.0  ;;  %v112_v36 = vmax.f32 %v74_v21, 1.0  ;;  %vm973_vm11 = vcmp.lt.s32.totalorder %v157_v19, 0 }
  0x1b   :  { %vm878_vm10 = vcmp.lt.s32.totalorder %v138_v28, 0  ;;  %v879_v34 = vceil.f32 %v138_v28  ;;  %v880_v35 = vfloor.f32 %v138_v28  ;;  %v54_v41 = vmul.f32 2.546479, %v16_v33 }
  0x1c   :  { %v129_v40 = vmin.f32 %v91_v32, 7.999999  ;;  %v936_v42 = vsel %vm933_vm9, %v934_v26, %v935_v27  ;;  %v139_v43 = vmin.f32 %v101_v24, 7.999999  ;;  %v82_v44 = vmul.f32 2.546479, %v44_v37 }
  0x1d   :  { %271 = vperm.xlu0 %1013, %v932_v25   ;;  %v881_v39 = vsel %vm878_vm10, %v879_v34, %v880_v35  ;;  %v976_v45 = vsel %vm973_vm11, %v974_v30, %v975_v31  ;;  %v150_v46 = vmin.f32 %v112_v36, 7.999999  ;;  %v64_v47 = vmul.f32 2.546479, %v26_v38  ;;  %v46_v25 = vld [vmem:[%s1305_s0 + $0x110] sm:$0xff] }
  0x1e   :  { %295 = vperm.xlu1 %1014, %v972_v22   ;;  %v882_v48 = vcvt.f32.s32 %v881_v39  ;;  %v92_v49 = vmax.f32 %v54_v41, 1.0  ;;  %v937_v50 = vcvt.f32.s32 %v936_v42  ;;  %v834_v51 = vceil.f32 %v129_v40  ;;  %v18_v42 = vld [vmem:[%s1305_s0 + $0x30] sm:$0xff] }
  0x1f   :  { %211 = vperm.xlu2 %1015, %v832_v29   ;;  %v835_v52 = vfloor.f32 %v129_v40  ;;  %v120_v53 = vmax.f32 %v82_v44, 1.0  ;;  %v977_v55 = vcvt.f32.s32 %v976_v45  ;;  %v884_v56 = vceil.f32 %v139_v43 }
  0x20   :  { %v885_v57 = vfloor.f32 %v139_v43  ;;  %vm833_vm12 = vcmp.lt.s32.totalorder %v129_v40, 0  ;;  %vm883_vm13 = vcmp.lt.s32.totalorder %v139_v43, 0  ;;  %v939_v58 = vceil.f32 %v150_v46  ;;  %v28_v40 = vld [vmem:[%s1305_s0 + $0x80] sm:$0xff] }
  0x21   :  { %v940_v59 = vfloor.f32 %v150_v46  ;;  %v102_v60 = vmax.f32 %v64_v47, 1.0  ;;  %vm938_vm14 = vcmp.lt.s32.totalorder %v150_v46, 0  ;;  %v130_v62 = vmin.f32 %v92_v49, 7.999999  ;;  %v39_v49 = vld [vmem:[%s1305_s0 + $0xd8] sm:$0xff] }
  0x22   :  { %v83_v63 = vmul.f32 2.546479, %v45_v54  ;;  %v836_v1 = vsel %vm833_vm12, %v834_v51, %v835_v52  ;;  %v158_v2 = vmin.f32 %v120_v53, 7.999999  ;;  %v886_v3 = vsel %vm883_vm13, %v884_v56, %v885_v57 }
  0x23   :  { %v941_v4 = vsel %vm938_vm14, %v939_v58, %v940_v59  ;;  %v140_v5 = vmin.f32 %v102_v60, 7.999999  ;;  %v55_v6 = vmul.f32 2.546479, %v17_v61  ;;  %v75_v7 = vmul.f32 2.546479, %v37_v0 }
  0x24   :  { %v837_v8 = vcvt.f32.s32 %v836_v1  ;;  %v839_v9 = vceil.f32 %v130_v62  ;;  %v840_v10 = vfloor.f32 %v130_v62  ;;  %v121_v11 = vmax.f32 %v83_v63, 1.0  ;;  %v19_v61 = vld [vmem:[%s1305_s0 + $0x38] sm:$0xff]  ;;  %v29_v1 = vld [vmem:[%s1305_s0 + $0x88] sm:$0xff] }
  0x25   :  { %241 = vperm.xlu0 %1013, %v882_v48   ;;  %v887_v12 = vcvt.f32.s32 %v886_v3  ;;  %vm838_vm15 = vcmp.lt.s32.totalorder %v130_v62, 0  ;;  %v979_v13 = vceil.f32 %v158_v2  ;;  %v980_v14 = vfloor.f32 %v158_v2  ;;  %v47_v3 = vld [vmem:[%s1305_s0 + $0x118] sm:$0xff] }
  0x26   :  { %274 = vperm.xlu1 %1014, %v937_v50   ;;  %v942_v16 = vcvt.f32.s32 %v941_v4  ;;  %vm978_vm0 = vcmp.lt.s32.totalorder %v158_v2, 0  ;;  %v113_v17 = vmax.f32 %v75_v7, 1.0  ;;  %v889_v19 = vceil.f32 %v140_v5 }
  0x27   :  { %298 = vperm.xlu2 %1015, %v977_v55   ;;  %v890_v20 = vfloor.f32 %v140_v5  ;;  %v93_v21 = vmax.f32 %v55_v6, 1.0  ;;  %v841_v22 = vsel %vm838_vm15, %v839_v9, %v840_v10  ;;  %vm888_vm1 = vcmp.lt.s32.totalorder %v140_v5, 0 }
  0x28   :  { %v159_v23 = vmin.f32 %v121_v11, 7.999999  ;;  %v76_v24 = vmul.f32 2.546479, %v38_v15  ;;  %v981_v26 = vsel %vm978_vm0, %v979_v13, %v980_v14  ;;  %v151_v27 = vmin.f32 %v113_v17, 7.999999 }
  0x29   :  { %v65_v28 = vmul.f32 2.546479, %v27_v18  ;;  %v842_v29 = vcvt.f32.s32 %v841_v22  ;;  %v891_v30 = vsel %vm888_vm1, %v889_v19, %v890_v20  ;;  %v131_v31 = vmin.f32 %v93_v21, 7.999999  ;;  %v48_v22 = vld [vmem:[%s1305_s0 + $0x120] sm:$0xff] }
  0x2a   :  { %v84_v32 = vmul.f32 2.546479, %v46_v25  ;;  %v982_v33 = vcvt.f32.s32 %v981_v26  ;;  %v984_v34 = vceil.f32 %v159_v23  ;;  %v985_v35 = vfloor.f32 %v159_v23 }
  0x2b   :  { %v114_v36 = vmax.f32 %v76_v24, 1.0  ;;  %vm983_vm2 = vcmp.lt.s32.totalorder %v159_v23, 0  ;;  %v944_v37 = vceil.f32 %v151_v27  ;;  %v945_v38 = vfloor.f32 %v151_v27 }
  0x2c   :  { %v103_v39 = vmax.f32 %v65_v28, 1.0  ;;  %v892_v41 = vcvt.f32.s32 %v891_v30  ;;  %vm943_vm3 = vcmp.lt.s32.totalorder %v151_v27, 0  ;;  %v844_v43 = vceil.f32 %v131_v31  ;;  %v40_v27 = vld [vmem:[%s1305_s0 + $0xe0] sm:$0xff] }
  0x2d   :  { %214 = vperm.xlu0 %1013, %v837_v8   ;;  %v845_v44 = vfloor.f32 %v131_v31  ;;  %v122_v45 = vmax.f32 %v84_v32, 1.0  ;;  %v986_v46 = vsel %vm983_vm2, %v984_v34, %v985_v35  ;;  %vm843_vm4 = vcmp.lt.s32.totalorder %v131_v31, 0  ;;  %v20_v32 = vld [vmem:[%s1305_s0 + $0x40] sm:$0xff] }
  0x2e   :  { %244 = vperm.xlu1 %1014, %v887_v12   ;;  %v152_v47 = vmin.f32 %v114_v36, 7.999999  ;;  %v66_v48 = vmul.f32 2.546479, %v28_v40  ;;  %v946_v50 = vsel %vm943_vm3, %v944_v37, %v945_v38  ;;  %v141_v51 = vmin.f32 %v103_v39, 7.999999 }
  0x2f   :  { %277 = vperm.xlu2 %1015, %v942_v16   ;;  %v56_v52 = vmul.f32 2.546479, %v18_v42  ;;  %v987_v53 = vcvt.f32.s32 %v986_v46  ;;  %v846_v54 = vsel %vm843_vm4, %v844_v43, %v845_v44  ;;  %v160_v55 = vmin.f32 %v122_v45, 7.999999 }
  0x30   :  { %v77_v56 = vmul.f32 2.546479, %v39_v49  ;;  %v947_v57 = vcvt.f32.s32 %v946_v50  ;;  %v949_v58 = vceil.f32 %v152_v47  ;;  %v950_v59 = vfloor.f32 %v152_v47 }
  0x31   :  { %v104_v60 = vmax.f32 %v66_v48, 1.0  ;;  %vm948_vm5 = vcmp.lt.s32.totalorder %v152_v47, 0  ;;  %v894_v62 = vceil.f32 %v141_v51  ;;  %v895_v63 = vfloor.f32 %v141_v51 }
  0x32   :  { %v94_v0 = vmax.f32 %v56_v52, 1.0  ;;  %v847_v2 = vcvt.f32.s32 %v846_v54  ;;  %vm893_vm6 = vcmp.lt.s32.totalorder %v141_v51, 0  ;;  %v989_v4 = vceil.f32 %v160_v55  ;;  %v30_v52 = vld [vmem:[%s1305_s0 + $0x90] sm:$0xff] }
  0x33   :  { %v990_v5 = vfloor.f32 %v160_v55  ;;  %v115_v6 = vmax.f32 %v77_v56, 1.0  ;;  %v57_v7 = vmul.f32 2.546479, %v19_v61  ;;  %v951_v8 = vsel %vm948_vm5, %v949_v58, %v950_v59  ;;  %v49_v56 = vld [vmem:[%s1305_s0 + $0x128] sm:$0xff] }
  0x34   :  { %vm988_vm7 = vcmp.lt.s32.totalorder %v160_v55, 0  ;;  %v142_v9 = vmin.f32 %v104_v60, 7.999999  ;;  %v67_v10 = vmul.f32 2.546479, %v29_v1  ;;  %v896_v11 = vsel %vm893_vm6, %v894_v62, %v895_v63 }
  0x35   :  { %301 = vperm.xlu0 %1013, %v982_v33   ;;  %v132_v12 = vmin.f32 %v94_v0, 7.999999  ;;  %v85_v13 = vmul.f32 2.546479, %v47_v3  ;;  %v952_v14 = vcvt.f32.s32 %v951_v8  ;;  %v991_v15 = vsel %vm988_vm7, %v989_v4, %v990_v5 }
  0x36   :  { %217 = vperm.xlu1 %1014, %v842_v29   ;;  %v153_v16 = vmin.f32 %v115_v6, 7.999999  ;;  %v95_v17 = vmax.f32 %v57_v7, 1.0  ;;  %v897_v18 = vcvt.f32.s32 %v896_v11  ;;  %v899_v19 = vceil.f32 %v142_v9  ;;  %v21_v11 = vld [vmem:[%s1305_s0 + $0x48] sm:$0xff] }
  0x37   :  { %247 = vperm.xlu2 %1015, %v892_v41   ;;  %v900_v20 = vfloor.f32 %v142_v9  ;;  %v105_v21 = vmax.f32 %v67_v10, 1.0  ;;  %vm898_vm8 = vcmp.lt.s32.totalorder %v142_v9, 0  ;;  %v849_v23 = vceil.f32 %v132_v12 }
  0x38   :  { %v850_v24 = vfloor.f32 %v132_v12  ;;  %v123_v25 = vmax.f32 %v85_v13, 1.0  ;;  %v992_v26 = vcvt.f32.s32 %v991_v15  ;;  %vm848_vm9 = vcmp.lt.s32.totalorder %v132_v12, 0  ;;  %v31_v13 = vld [vmem:[%s1305_s0 + $0x98] sm:$0xff] }
  0x39   :  { %v954_v28 = vceil.f32 %v153_v16  ;;  %v955_v29 = vfloor.f32 %v153_v16  ;;  %v133_v30 = vmin.f32 %v95_v17, 7.999999  ;;  %v86_v31 = vmul.f32 2.546479, %v48_v22 }
  0x3a   :  { %v901_v33 = vsel %vm898_vm8, %v899_v19, %v900_v20  ;;  %vm953_vm10 = vcmp.lt.s32.totalorder %v153_v16, 0  ;;  %v143_v34 = vmin.f32 %v105_v21, 7.999999  ;;  %v851_v35 = vsel %vm848_vm9, %v849_v23, %v850_v24 }
  0x3b   :  { %v161_v36 = vmin.f32 %v123_v25, 7.999999  ;;  %v78_v37 = vmul.f32 2.546479, %v40_v27  ;;  %v58_v38 = vmul.f32 2.546479, %v20_v32  ;;  %v902_v39 = vcvt.f32.s32 %v901_v33 }
  0x3c   :  { %v956_v40 = vsel %vm953_vm10, %v954_v28, %v955_v29  ;;  %vm853_vm11 = vcmp.lt.s32.totalorder %v133_v30, 0  ;;  %v124_v41 = vmax.f32 %v86_v31, 1.0  ;;  %v852_v42 = vcvt.f32.s32 %v851_v35  ;;  %v433_v31 = vld [vmem:[%s1306_s1 + $0x8] sm:$0xff] }
  0x3d   :  { %280 = vperm.xlu0 %1013, %v947_v57   ;;  %v854_v43 = vceil.f32 %v133_v30  ;;  %v855_v44 = vfloor.f32 %v133_v30  ;;  %v904_v45 = vceil.f32 %v143_v34  ;;  %v905_v46 = vfloor.f32 %v143_v34  ;;  %812 = vmatpush.msra.mxu1 %v433_v31 }
  0x3e   :  { %304 = vperm.xlu1 %1014, %v987_v53   ;;  %v994_v47 = vceil.f32 %v161_v36  ;;  %v995_v48 = vfloor.f32 %v161_v36  ;;  %v116_v49 = vmax.f32 %v78_v37, 1.0  ;;  %v957_v50 = vcvt.f32.s32 %v956_v40  ;;  %v41_v53 = vld [vmem:[%s1305_s0 + $0xe8] sm:$0xff]  ;;  %813 = vmatpush.msra.mxu2 %v433_v31 }
  0x3f   :  { %220 = vperm.xlu2 %1015, %v847_v2   ;;  %vm903_vm12 = vcmp.lt.s32.totalorder %v143_v34, 0  ;;  %vm993_vm13 = vcmp.lt.s32.totalorder %v161_v36, 0  ;;  %v96_v51 = vmax.f32 %v58_v38, 1.0  ;;  %v856_v54 = vsel %vm853_vm11, %v854_v43, %v855_v44  ;;  %563 = vmatpush.msra.mxu0 %v433_v31  ;;  %v432_v43 = vld [vmem:[%s1306_s1] sm:$0xff]  ;;  %s1044_s1 = smov [#allocation2]  }
  0x40   :  { %v162_v55 = vmin.f32 %v124_v41, 7.999999  ;;  %v906_v57 = vsel %vm903_vm12, %v904_v45, %v905_v46  ;;  %v996_v58 = vsel %vm993_vm13, %v994_v47, %v995_v48  ;;  %v154_v59 = vmin.f32 %v116_v49, 7.999999  ;;  %814 = vmatpush.msra.mxu3 %v433_v31  ;;  %815 = vmatpush.msra.mxu1 %v432_v43  ;;  %s722_s4 = sshll.u32 %s1044_s1, 4  ;;  %s723_s4 = int_to_ptr.vmem [resolvable:$true] %s722_s4 }
  0x41   :  { %v68_v60 = vmul.f32 2.546479, %v30_v52  ;;  %v134_v61 = vmin.f32 %v96_v51, 7.999999  ;;  %v79_v62 = vmul.f32 2.546479, %v41_v53  ;;  %v857_v63 = vcvt.f32.s32 %v856_v54  ;;  %816 = vmatpush.msra.mxu2 %v432_v43  ;;  %564 = vmatpush.msra.mxu0 %v432_v43 }
  0x42   :  { %v87_v0 = vmul.f32 2.546479, %v49_v56  ;;  %v907_v1 = vcvt.f32.s32 %v906_v57  ;;  %v997_v2 = vcvt.f32.s32 %v996_v58  ;;  %vm998_vm14 = vcmp.lt.s32.totalorder %v162_v55, 0  ;;  %817 = vmatpush.msra.mxu3 %v432_v43 }
  0x43   :  { %v999_v3 = vceil.f32 %v162_v55  ;;  %v1000_v4 = vfloor.f32 %v162_v55  ;;  %v959_v5 = vceil.f32 %v154_v59  ;;  %v960_v6 = vfloor.f32 %v154_v59 }
  0x44   :  { %v106_v7 = vmax.f32 %v68_v60, 1.0  ;;  %v859_v8 = vceil.f32 %v134_v61  ;;  %v860_v9 = vfloor.f32 %v134_v61  ;;  %vm958_vm15 = vcmp.lt.s32.totalorder %v154_v59, 0 }
  0x45   :  { %250 = vperm.xlu0 %1013, %v897_v18   ;;  %v117_v10 = vmax.f32 %v79_v62, 1.0  ;;  %vm858_vm0 = vcmp.lt.s32.totalorder %v134_v61, 0  ;;  %v125_v12 = vmax.f32 %v87_v0, 1.0  ;;  %v961_v15 = vsel %vm958_vm15, %v959_v5, %v960_v6 }
  0x46   :  { %283 = vperm.xlu1 %1014, %v952_v14   ;;  %v1001_v14 = vsel %vm998_vm14, %v999_v3, %v1000_v4  ;;  %v144_v16 = vmin.f32 %v106_v7, 7.999999  ;;  %v59_v17 = vmul.f32 2.546479, %v21_v11  ;;  %v861_v18 = vsel %vm858_vm0, %v859_v8, %v860_v9 }
  0x47   :  { %307 = vperm.xlu2 %1015, %v992_v26   ;;  %v155_v19 = vmin.f32 %v117_v10, 7.999999  ;;  %v69_v20 = vmul.f32 2.546479, %v31_v13  ;;  %v163_v21 = vmin.f32 %v125_v12, 7.999999  ;;  %v1002_v22 = vcvt.f32.s32 %v1001_v14 }
  0x48   :  { %v962_v23 = vcvt.f32.s32 %v961_v15  ;;  %v862_v24 = vcvt.f32.s32 %v861_v18  ;;  %v909_v25 = vceil.f32 %v144_v16  ;;  %v910_v26 = vfloor.f32 %v144_v16 }
  0x49   :  { %v97_v27 = vmax.f32 %v59_v17, 1.0  ;;  %v964_v28 = vceil.f32 %v155_v19  ;;  %v965_v29 = vfloor.f32 %v155_v19  ;;  %vm908_vm1 = vcmp.lt.s32.totalorder %v144_v16, 0 }
  0x4a   :  { %v107_v30 = vmax.f32 %v69_v20, 1.0  ;;  %vm963_vm2 = vcmp.lt.s32.totalorder %v155_v19, 0  ;;  %v1004_v32 = vceil.f32 %v163_v21  ;;  %v1005_v33 = vfloor.f32 %v163_v21 }
  0x4b   :  { %vm1003_vm3 = vcmp.lt.s32.totalorder %v163_v21, 0  ;;  %v911_v34 = vsel %vm908_vm1, %v909_v25, %v910_v26  ;;  %v135_v35 = vmin.f32 %v97_v27, 7.999999  ;;  %v966_v36 = vsel %vm963_vm2, %v964_v28, %v965_v29 }
  0x4c   :  { %v145_v37 = vmin.f32 %v107_v30, 7.999999  ;;  %v1006_v38 = vsel %vm1003_vm3, %v1004_v32, %v1005_v33  ;;  %v967_v40 = vcvt.f32.s32 %v966_v36  ;;  %v202_v53 = vlaneseq }
  0x4d   :  { %223 = vperm.xlu0 %1013, %v852_v42   ;;  %v864_v41 = vceil.f32 %v135_v35  ;;  %v865_v42 = vfloor.f32 %v135_v35  ;;  %v1007_v44 = vcvt.f32.s32 %v1006_v38  ;;  %vm863_vm4 = vcmp.lt.s32.totalorder %v135_v35, 0 }
  0x4e   :  { %253 = vperm.xlu1 %1014, %v902_v39   ;;  %v912_v39 = vcvt.f32.s32 %v911_v34  ;;  %v914_v45 = vceil.f32 %v145_v37  ;;  %v915_v46 = vfloor.f32 %v145_v37  ;;  %vm913_vm5 = vcmp.lt.s32.totalorder %v145_v37, 0 }
  0x4f   :  { %286 = vperm.xlu2 %1015, %v957_v50   ;;  %v866_v47 = vsel %vm863_vm4, %v864_v41, %v865_v42  ;;  %v1186_v55 = vand.u32 127, %v202_v53  ;;  %vm434_vm6 = vcmask 130048   ;;  %v1043_v58 = vmov 0.0  }
  0x50   :  { %v916_v48 = vsel %vm913_vm5, %v914_v45, %v915_v46  ;;  %v867_v50 = vcvt.f32.s32 %v866_v47 }
  0x51   :  { %v917_v51 = vcvt.f32.s32 %v916_v48 }
  0x55   :  { %310 = vperm.xlu0 %1013, %v997_v2  }
  0x56   :  { %226 = vperm.xlu1 %1014, %v857_v63  }
  0x57   :  { %256 = vperm.xlu2 %1015, %v907_v1  }
  0x5d   :  { %289 = vperm.xlu0 %1013, %v962_v23  }
  0x5e   :  { %313 = vperm.xlu1 %1014, %v1002_v22  }
  0x5f   :  { %229 = vperm.xlu2 %1015, %v862_v24  }
  0x65   :  { %259 = vperm.xlu0 %1013, %v912_v39  }
  0x66   :  { %292 = vperm.xlu1 %1014, %v967_v40  }
  0x67   :  { %316 = vperm.xlu2 %1015, %v1007_v44  }
  0x69   :  { %v209_v49 = vpop.permute.xlu2 %208 }
  0x6a   :  { %vm319_vm12 = vcmp.eq.s32.totalorder %v1186_v55, %v209_v49 }
  0x6b   :  { %v737_v6 = vsel %vm319_vm12, 1.0, %v1043_v58 }
  0x6d   :  { %232 = vperm.xlu0 %1013, %v867_v50  }
  0x6e   :  { %262 = vperm.xlu1 %1014, %v917_v51  }
  0x71   :  { %v239_v52 = vpop.permute.xlu2 %238 }
  0x72   :  { %vm329_vm9 = vcmp.eq.s32.totalorder %v1186_v55, %v239_v52 }
  0x73   :  { %v747_v1 = vsel %vm329_vm9, 1.0, %v1043_v58 }
  0x79   :  { %v212_v54 = vpop.permute.xlu2 %211 }
  0x7a   :  { %vm320_vm15 = vcmp.eq.s32.totalorder %v1186_v55, %v212_v54 }
  0x7b   :  { %v738_v12 = vsel %vm320_vm15, 1.0, %v1043_v58 }
  0x7f   :  { %v266_v56 = vpop.permute.xlu0 %265 }
  0x80   :  { %vm338_vm7 = vcmp.eq.s32.totalorder %v1186_v55, %v266_v56  ;;  %v236_v57 = vpop.permute.xlu1 %235 }
  0x81   :  { %v756_v59 = vsel %vm338_vm7, 1.0, %v1043_v58  ;;  %vm328_vm8 = vcmp.eq.s32.totalorder %v1186_v55, %v236_v57  ;;  %v299_v61 = vpop.permute.xlu2 %298 }
  0x82   :  { %v746_v60 = vsel %vm328_vm8, 1.0, %v1043_v58  ;;  %794 = vmatmul.msk.f32.vlgmr.msra.gmra.mxu2 %vm434_vm6, %v756_v59  ;;  %vm349_vm0 = vcmp.eq.s32.totalorder %v1186_v55, %v299_v61 }
  0x83   :  { %784 = vmatmul.msk.f32.vlgmr.msra.gmra.mxu1 %vm434_vm6, %v746_v60  ;;  %v767_v14 = vsel %vm349_vm0, 1.0, %v1043_v58 }
  0x87   :  { %v206_v62 = vpop.permute.xlu0 %205 }
  0x88   :  { %v269_v63 = vpop.permute.xlu1 %268  ;;  %vm318_vm10 = vcmp.eq.s32.totalorder %v1186_v55, %v206_v62 }
  0x89   :  { %vm339_vm11 = vcmp.eq.s32.totalorder %v1186_v55, %v269_v63  ;;  %v736_v0 = vsel %vm318_vm10, 1.0, %v1043_v58  ;;  %v278_v3 = vpop.permute.xlu2 %277 }
  0x8a   :  { %v757_v2 = vsel %vm339_vm11, 1.0, %v1043_v58  ;;  %774 = vmatmul.msk.f32.vlgmr.msra.gmra.mxu0 %vm434_vm6, %v736_v0  ;;  %vm342_vm3 = vcmp.eq.s32.totalorder %v1186_v55, %v278_v3 }
  0x8b   :  { %785 = vmatmul.msk.f32.gmra.mxu1 %vm434_vm6, %v747_v1  ;;  %795 = vmatmul.msk.f32.gmra.mxu2 %vm434_vm6, %v757_v2  ;;  %v760_v19 = vsel %vm342_vm3, 1.0, %v1043_v58 }
  0x8f   :  { %v272_v4 = vpop.permute.xlu0 %271 }
  0x90   :  { %v296_v5 = vpop.permute.xlu1 %295  ;;  %vm340_vm13 = vcmp.eq.s32.totalorder %v1186_v55, %v272_v4 }
  0x91   :  { %vm348_vm14 = vcmp.eq.s32.totalorder %v1186_v55, %v296_v5  ;;  %v758_v7 = vsel %vm340_vm13, 1.0, %v1043_v58  ;;  %v248_v10 = vpop.permute.xlu2 %247 }
  0x92   :  { %v766_v8 = vsel %vm348_vm14, 1.0, %v1043_v58  ;;  %775 = vmatmul.msk.f32.gmra.mxu0 %vm434_vm6, %v737_v6  ;;  %vm332_vm7 = vcmp.eq.s32.totalorder %v1186_v55, %v248_v10 }
  0x93   :  { %796 = vmatmul.msk.f32.gmra.mxu2 %vm434_vm6, %v758_v7  ;;  %804 = vmatmul.msk.f32.vlgmr.msra.gmra.mxu3 %vm434_vm6, %v766_v8  ;;  %v750_v25 = vsel %vm332_vm7, 1.0, %v1043_v58 }
  0x97   :  { %v242_v9 = vpop.permute.xlu0 %241 }
  0x98   :  { %v275_v11 = vpop.permute.xlu1 %274  ;;  %vm330_vm1 = vcmp.eq.s32.totalorder %v1186_v55, %v242_v9 }
  0x99   :  { %vm341_vm2 = vcmp.eq.s32.totalorder %v1186_v55, %v275_v11  ;;  %v748_v13 = vsel %vm330_vm1, 1.0, %v1043_v58  ;;  %v221_v20 = vpop.permute.xlu2 %220 }
  0x9a   :  { %v759_v15 = vsel %vm341_vm2, 1.0, %v1043_v58  ;;  %776 = vmatmul.msk.f32.gmra.mxu0 %vm434_vm6, %v738_v12  ;;  %786 = vmatmul.msk.f32.gmra.mxu1 %vm434_vm6, %v748_v13  ;;  %vm323_vm10 = vcmp.eq.s32.totalorder %v1186_v55, %v221_v20 }
  0x9b   :  { %797 = vmatmul.msk.f32.gmra.mxu2 %vm434_vm6, %v759_v15  ;;  %805 = vmatmul.msk.f32.gmra.mxu3 %vm434_vm6, %v767_v14  ;;  %v741_v31 = vsel %vm323_vm10, 1.0, %v1043_v58 }
  0x9f   :  { %v215_v16 = vpop.permute.xlu0 %214 }
  0xa0   :  { %v245_v17 = vpop.permute.xlu1 %244  ;;  %vm321_vm4 = vcmp.eq.s32.totalorder %v1186_v55, %v215_v16 }
  0xa1   :  { %vm331_vm5 = vcmp.eq.s32.totalorder %v1186_v55, %v245_v17  ;;  %v739_v18 = vsel %vm321_vm4, 1.0, %v1043_v58  ;;  %v308_v27 = vpop.permute.xlu2 %307 }
  0xa2   :  { %v749_v21 = vsel %vm331_vm5, 1.0, %v1043_v58  ;;  %777 = vmatmul.msk.f32.gmra.mxu0 %vm434_vm6, %v739_v18  ;;  %vm352_vm13 = vcmp.eq.s32.totalorder %v1186_v55, %v308_v27 }
  0xa3   :  { %787 = vmatmul.msk.f32.gmra.mxu1 %vm434_vm6, %v749_v21  ;;  %798 = vmatmul.msk.f32.gmra.mxu2 %vm434_vm6, %v760_v19  ;;  %v770_v37 = vsel %vm352_vm13, 1.0, %v1043_v58 }
  0xa7   :  { %v302_v22 = vpop.permute.xlu0 %301 }
  0xa8   :  { %v218_v23 = vpop.permute.xlu1 %217  ;;  %vm350_vm8 = vcmp.eq.s32.totalorder %v1186_v55, %v302_v22 }
  0xa9   :  { %vm322_vm9 = vcmp.eq.s32.totalorder %v1186_v55, %v218_v23  ;;  %v768_v24 = vsel %vm350_vm8, 1.0, %v1043_v58  ;;  %v287_v33 = vpop.permute.xlu2 %286 }
  0xaa   :  { %v740_v26 = vsel %vm322_vm9, 1.0, %v1043_v58  ;;  %806 = vmatmul.msk.f32.gmra.mxu3 %vm434_vm6, %v768_v24  ;;  %vm345_vm0 = vcmp.eq.s32.totalorder %v1186_v55, %v287_v33 }
  0xab   :  { %778 = vmatmul.msk.f32.gmra.mxu0 %vm434_vm6, %v740_v26  ;;  %788 = vmatmul.msk.f32.gmra.mxu1 %vm434_vm6, %v750_v25  ;;  %v763_v43 = vsel %vm345_vm0, 1.0, %v1043_v58 }
  0xaf   :  { %v281_v28 = vpop.permute.xlu0 %280 }
  0xb0   :  { %v305_v29 = vpop.permute.xlu1 %304  ;;  %vm343_vm11 = vcmp.eq.s32.totalorder %v1186_v55, %v281_v28 }
  0xb1   :  { %vm351_vm12 = vcmp.eq.s32.totalorder %v1186_v55, %v305_v29  ;;  %v761_v30 = vsel %vm343_vm11, 1.0, %v1043_v58  ;;  %v257_v40 = vpop.permute.xlu2 %256 }
  0xb2   :  { %v769_v32 = vsel %vm351_vm12, 1.0, %v1043_v58  ;;  %799 = vmatmul.msk.f32.gmra.mxu2 %vm434_vm6, %v761_v30  ;;  %vm335_vm3 = vcmp.eq.s32.totalorder %v1186_v55, %v257_v40 }
  0xb3   :  { %779 = vmatmul.msk.f32.gmra.mxu0 %vm434_vm6, %v741_v31  ;;  %807 = vmatmul.msk.f32.gmra.mxu3 %vm434_vm6, %v769_v32  ;;  %v753_v48 = vsel %vm335_vm3, 1.0, %v1043_v58 }
  0xb7   :  { %v251_v34 = vpop.permute.xlu0 %250 }
  0xb8   :  { %v284_v35 = vpop.permute.xlu1 %283  ;;  %vm333_vm14 = vcmp.eq.s32.totalorder %v1186_v55, %v251_v34 }
  0xb9   :  { %vm344_vm15 = vcmp.eq.s32.totalorder %v1186_v55, %v284_v35  ;;  %v751_v36 = vsel %vm333_vm14, 1.0, %v1043_v58  ;;  %v230_v49 = vpop.permute.xlu2 %229 }
  0xba   :  { %v762_v38 = vsel %vm344_vm15, 1.0, %v1043_v58  ;;  %789 = vmatmul.msk.f32.gmra.mxu1 %vm434_vm6, %v751_v36  ;;  %vm326_vm7 = vcmp.eq.s32.totalorder %v1186_v55, %v230_v49 }
  0xbb   :  { %800 = vmatmul.msk.f32.gmra.mxu2 %vm434_vm6, %v762_v38  ;;  %808 = vmatmul.msk.f32.gmra.mxu3 %vm434_vm6, %v770_v37  ;;  %v744_v54 = vsel %vm326_vm7, 1.0, %v1043_v58 }
  0xbf   :  { %v224_v39 = vpop.permute.xlu0 %223 }
  0xc0   :  { %v254_v41 = vpop.permute.xlu1 %253  ;;  %vm324_vm1 = vcmp.eq.s32.totalorder %v1186_v55, %v224_v39 }
  0xc1   :  { %vm334_vm2 = vcmp.eq.s32.totalorder %v1186_v55, %v254_v41  ;;  %v742_v42 = vsel %vm324_vm1, 1.0, %v1043_v58  ;;  %v317_v57 = vpop.permute.xlu2 %316 }
  0xc2   :  { %v752_v44 = vsel %vm334_vm2, 1.0, %v1043_v58  ;;  %780 = vmatmul.msk.f32.gmra.mxu0 %vm434_vm6, %v742_v42  ;;  %vm355_vm10 = vcmp.eq.s32.totalorder %v1186_v55, %v317_v57 }
  0xc3   :  { %790 = vmatmul.msk.f32.gmra.mxu1 %vm434_vm6, %v752_v44  ;;  %801 = vmatmul.msk.f32.gmra.mxu2 %vm434_vm6, %v763_v43  ;;  %v773_v62 = vsel %vm355_vm10, 1.0, %v1043_v58 }
  0xc7   :  { %v311_v45 = vpop.permute.xlu0 %310 }
  0xc8   :  { %v227_v46 = vpop.permute.xlu1 %226  ;;  %vm353_vm4 = vcmp.eq.s32.totalorder %v1186_v55, %v311_v45 }
  0xc9   :  { %vm325_vm5 = vcmp.eq.s32.totalorder %v1186_v55, %v227_v46  ;;  %v771_v47 = vsel %vm353_vm4, 1.0, %v1043_v58 }
  0xca   :  { %v743_v50 = vsel %vm325_vm5, 1.0, %v1043_v58  ;;  %809 = vmatmul.msk.f32.gmra.mxu3 %vm434_vm6, %v771_v47 }
  0xcb   :  { %781 = vmatmul.msk.f32.gmra.mxu0 %vm434_vm6, %v743_v50  ;;  %791 = vmatmul.msk.f32.gmra.mxu1 %vm434_vm6, %v753_v48 }
  0xcf   :  { %v290_v51 = vpop.permute.xlu0 %289 }
  0xd0   :  { %v314_v52 = vpop.permute.xlu1 %313  ;;  %vm346_vm8 = vcmp.eq.s32.totalorder %v1186_v55, %v290_v51 }
  0xd1   :  { %vm354_vm9 = vcmp.eq.s32.totalorder %v1186_v55, %v314_v52  ;;  %v764_v53 = vsel %vm346_vm8, 1.0, %v1043_v58 }
  0xd2   :  { %v772_v56 = vsel %vm354_vm9, 1.0, %v1043_v58  ;;  %802 = vmatmul.msk.f32.gmra.mxu2 %vm434_vm6, %v764_v53 }
  0xd3   :  { %782 = vmatmul.msk.f32.gmra.mxu0 %vm434_vm6, %v744_v54  ;;  %810 = vmatmul.msk.f32.gmra.mxu3 %vm434_vm6, %v772_v56 }
  0xd7   :  { %v260_v59 = vpop.permute.xlu0 %259 }
  0xd8   :  { %v293_v60 = vpop.permute.xlu1 %292  ;;  %vm336_vm11 = vcmp.eq.s32.totalorder %v1186_v55, %v260_v59 }
  0xd9   :  { %vm347_vm12 = vcmp.eq.s32.totalorder %v1186_v55, %v293_v60  ;;  %v754_v61 = vsel %vm336_vm11, 1.0, %v1043_v58 }
  0xda   :  { %v765_v63 = vsel %vm347_vm12, 1.0, %v1043_v58  ;;  %792 = vmatmul.msk.f32.gmra.mxu1 %vm434_vm6, %v754_v61 }
  0xdb   :  { %803 = vmatmul.msk.f32.gmra.mxu2 %vm434_vm6, %v765_v63  ;;  %811 = vmatmul.msk.f32.gmra.mxu3 %vm434_vm6, %v773_v62 }
  0xdf   :  { %v233_v0 = vpop.permute.xlu0 %232 }
  0xe0   :  { %v263_v1 = vpop.permute.xlu1 %262  ;;  %vm327_vm13 = vcmp.eq.s32.totalorder %v1186_v55, %v233_v0 }
  0xe1   :  { %vm337_vm14 = vcmp.eq.s32.totalorder %v1186_v55, %v263_v1  ;;  %v745_v2 = vsel %vm327_vm13, 1.0, %v1043_v58 }
  0xe2   :  { %v755_v3 = vsel %vm337_vm14, 1.0, %v1043_v58  ;;  %783 = vmatmul.msk.f32.gmra.mxu0 %vm434_vm6, %v745_v2 }
  0xe3   :  { %793 = vmatmul.msk.f32.gmra.mxu1 %vm434_vm6, %v755_v3 }
 0x100   :  { %v596_v4 = vpop.f32.mrf.mxu1 }
 0x101   :  { %690 = vst [vmem:[#allocation2 + $0x50] sm:$0xff] %v596_v4 }
 0x105   :  { %v626_v5 = vpop.f32.mrf.mxu2 }
 0x106   :  { %700 = vst [vmem:[#allocation2 + $0xa0] sm:$0xff] %v626_v5 }
 0x107   :  { %v566_v6 = vpop.f32.mrf.mxu0 }
 0x108   :  { %680 = vst [vmem:[#allocation2] sm:$0xff] %v566_v6  ;;  %v599_v7 = vpop.f32.mrf.mxu1 }
 0x109   :  { %691 = vst [vmem:[#allocation2 + $0x58] sm:$0xff] %v599_v7 }
 0x10e   :  { %v629_v8 = vpop.f32.mrf.mxu2 }
 0x10f   :  { %701 = vst [vmem:[#allocation2 + $0xa8] sm:$0xff] %v629_v8  ;;  %v569_v9 = vpop.f32.mrf.mxu0 }
 0x110   :  { %681 = vst [vmem:[#allocation2 + $0x8] sm:$0xff] %v569_v9 }
 0x116   :  { %v632_v55 = vpop.f32.mrf.mxu2  ;;  %v656_v10 = vpop.f32.mrf.mxu3 }
 0x117   :  { %702 = vst [vmem:[#allocation2 + $0xb0] sm:$0xff] %v632_v55  ;;  %v572_v58 = vpop.f32.mrf.mxu0  ;;  %v602_v11 = vpop.f32.mrf.mxu1 }
 0x118   :  { %710 = vst [vmem:[#allocation2 + $0xf0] sm:$0xff] %v656_v10 }
 0x119   :  { %682 = vst [vmem:[#allocation2 + $0x10] sm:$0xff] %v572_v58 }
 0x11a   :  { %692 = vst [vmem:[#allocation2 + $0x60] sm:$0xff] %v602_v11 }
 0x11e   :  { %v635_v12 = vpop.f32.mrf.mxu2  ;;  %v659_v13 = vpop.f32.mrf.mxu3 }
 0x11f   :  { %703 = vst [vmem:[#allocation2 + $0xb8] sm:$0xff] %v635_v12  ;;  %v575_v14 = vpop.f32.mrf.mxu0 }
 0x120   :  { %711 = vst [vmem:[#allocation2 + $0xf8] sm:$0xff] %v659_v13  ;;  %v605_v15 = vpop.f32.mrf.mxu1 }
 0x121   :  { %683 = vst [vmem:[#allocation2 + $0x18] sm:$0xff] %v575_v14 }
 0x122   :  { %693 = vst [vmem:[#allocation2 + $0x68] sm:$0xff] %v605_v15 }
 0x126   :  { %v638_v16 = vpop.f32.mrf.mxu2 }
 0x127   :  { %704 = vst [vmem:[#allocation2 + $0xc0] sm:$0xff] %v638_v16 }
 0x128   :  { %v578_v17 = vpop.f32.mrf.mxu0  ;;  %v608_v18 = vpop.f32.mrf.mxu1 }
 0x129   :  { %684 = vst [vmem:[#allocation2 + $0x20] sm:$0xff] %v578_v17 }
 0x12a   :  { %694 = vst [vmem:[#allocation2 + $0x70] sm:$0xff] %v608_v18 }
 0x12d   :  { %v662_v19 = vpop.f32.mrf.mxu3 }
 0x12e   :  { %712 = vst [vmem:[#allocation2 + $0x100] sm:$0xff] %v662_v19 }
 0x130   :  { %v581_v20 = vpop.f32.mrf.mxu0 }
 0x131   :  { %685 = vst [vmem:[#allocation2 + $0x28] sm:$0xff] %v581_v20 }
 0x135   :  { %v641_v21 = vpop.f32.mrf.mxu2 }
 0x136   :  { %705 = vst [vmem:[#allocation2 + $0xc8] sm:$0xff] %v641_v21  ;;  %v665_v22 = vpop.f32.mrf.mxu3 }
 0x137   :  { %713 = vst [vmem:[#allocation2 + $0x108] sm:$0xff] %v665_v22  ;;  %v611_v23 = vpop.f32.mrf.mxu1 }
 0x138   :  { %695 = vst [vmem:[#allocation2 + $0x78] sm:$0xff] %v611_v23 }
 0x13e   :  { %v644_v24 = vpop.f32.mrf.mxu2  ;;  %v668_v25 = vpop.f32.mrf.mxu3 }
 0x13f   :  { %706 = vst [vmem:[#allocation2 + $0xd0] sm:$0xff] %v644_v24  ;;  %v584_v26 = vpop.f32.mrf.mxu0 }
 0x140   :  { %714 = vst [vmem:[#allocation2 + $0x110] sm:$0xff] %v668_v25  ;;  %v614_v27 = vpop.f32.mrf.mxu1 }
 0x141   :  { %686 = vst [vmem:[#allocation2 + $0x30] sm:$0xff] %v584_v26 }
 0x142   :  { %696 = vst [vmem:[#allocation2 + $0x80] sm:$0xff] %v614_v27 }
 0x146   :  { %v647_v28 = vpop.f32.mrf.mxu2 }
 0x147   :  { %707 = vst [vmem:[#allocation2 + $0xd8] sm:$0xff] %v647_v28 }
 0x148   :  { %v587_v29 = vpop.f32.mrf.mxu0  ;;  %v617_v30 = vpop.f32.mrf.mxu1 }
 0x149   :  { %687 = vst [vmem:[#allocation2 + $0x38] sm:$0xff] %v587_v29 }
 0x14a   :  { %697 = vst [vmem:[#allocation2 + $0x88] sm:$0xff] %v617_v30 }
 0x14d   :  { %v671_v31 = vpop.f32.mrf.mxu3 }
 0x14e   :  { %715 = vst [vmem:[#allocation2 + $0x118] sm:$0xff] %v671_v31 }
 0x150   :  { %v590_v32 = vpop.f32.mrf.mxu0 }
 0x151   :  { %688 = vst [vmem:[#allocation2 + $0x40] sm:$0xff] %v590_v32 }
 0x155   :  { %v650_v33 = vpop.f32.mrf.mxu2 }
 0x156   :  { %708 = vst [vmem:[#allocation2 + $0xe0] sm:$0xff] %v650_v33  ;;  %v674_v34 = vpop.f32.mrf.mxu3 }
 0x157   :  { %716 = vst [vmem:[#allocation2 + $0x120] sm:$0xff] %v674_v34  ;;  %v620_v35 = vpop.f32.mrf.mxu1 }
 0x158   :  { %698 = vst [vmem:[#allocation2 + $0x90] sm:$0xff] %v620_v35 }
 0x15e   :  { %v653_v36 = vpop.f32.mrf.mxu2  ;;  %v677_v37 = vpop.f32.mrf.mxu3 }
 0x15f   :  { %709 = vst [vmem:[#allocation2 + $0xe8] sm:$0xff] %v653_v36  ;;  %v593_v38 = vpop.f32.mrf.mxu0 }
 0x160   :  { %717 = vst [vmem:[#allocation2 + $0x128] sm:$0xff] %v677_v37  ;;  %v623_v39 = vpop.f32.mrf.mxu1 }
 0x161   :  { %689 = vst [vmem:[#allocation2 + $0x48] sm:$0xff] %v593_v38 }
 0x162   :  { %699 = vst [vmem:[#allocation2 + $0x98] sm:$0xff] %v623_v39 }
 0x163   :  { %730 = dma.vmem_to_hbm [thread:$0]  %s723_s4, 4864, %s725_s7, [#allocation3], %s1045_s8, %s1045_s8, %s1046_s9  }
 0x164   :  { %1040 = dma.done.wait [#allocation3], 4864  }
 0x165   :  { %1041 = vsyncadd [#allocation3], 4294962432 }
 0x166   :  { %735 = vsyncpa [#allocation3], 1 }

</bundles_post_ra>
